<compile_context>
chip_gen: v7x
topology: tpu7x:2x2x1
jax: 0.10.0
libtpu: 0.0.40
codegen_flags: <defaults>
</compile_context>

<pallas_src>
import jax
import jax.numpy as jnp
from jax.experimental import pallas as pl
from jax.experimental.pallas import tpu as pltpu

_LANE = 128            # lane width; block dims are multiples of this or full dims
_TILE_BYTES = 4 << 20  # ~4 MiB per tile buffer (byte budget, not element count)


def _round_up(x, m):
    return ((x + m - 1) // m) * m


def _swap_axes_kernel(x_ref, o_ref):
    # x_ref block: (TN, TC); o_ref block: (TC, TN)  (batch dim squeezed away).
    x = x_ref[...]
    tn, tc = x.shape
    itemsize = x.dtype.itemsize
    aligned = (tn % _LANE == 0) and (tc % _LANE == 0)
    if itemsize >= 4 or (itemsize == 2 and aligned):
        # Native (packed) XLU transpose: bit-exact, no f32 temp, no VPU casts.
        o_ref[...] = x.T
    else:
        # Small/unaligned sub-32-bit blocks and 1-byte dtypes: transpose on
        # 32-bit granules (value-exact for bf16 / int8 / fp8; temp is tiny
        # because this path is only taken for small full-dim blocks).
        o_ref[...] = x.astype(jnp.float32).T.astype(o_ref.dtype)


def _pick_tiles(B, N, C, itemsize):
    """Byte-budgeted (tn, tc). Each dim is either a multiple of 128 or the full dim."""
    budget_elems = _TILE_BYTES // itemsize
    if itemsize < 2:
        budget_elems = _TILE_BYTES // 4  # bound the f32-upcast temp for 1-byte dtypes

    # Channels first, capped at 1024; leftover budget widens tn (output lane dim).
    tc_cap = min(_round_up(C, _LANE), 1024)
    tc = C if tc_cap >= C else tc_cap

    tn_cap = max(_LANE, (budget_elems // max(tc, _LANE)) // _LANE * _LANE)
    tn = N if tn_cap >= N else tn_cap

    # v7x has 2 TensorCores sharded over parallel grid axes: with B == 1 make
    # sure there are >= 2 steps along N so both cores get work.
    if B == 1 and N >= 2 * _LANE and pl.cdiv(N, tn) < 2:
        tn = _round_up(pl.cdiv(N, 2), _LANE)
    return tn, tc


def swap_axes(x):
    """Pallas equivalent of PyTorch `x.transpose(1, 2).contiguous()`.

    x: (B, N, C) -> (B, C, N), contiguous.
    """
    B, N, C = x.shape
    itemsize = x.dtype.itemsize
    tn, tc = _pick_tiles(B, N, C, itemsize)

    # Ragged N / C handled by Pallas partial edge blocks (OOB reads padded,
    # OOB writes masked); correctness holds because in-bounds output positions
    # only depend on in-bounds input positions under a transpose.
    grid = (B, pl.cdiv(N, tn), pl.cdiv(C, tc))

    tile_bytes = tn * tc * itemsize
    # Worst-case in-kernel temporaries: loaded value + transposed value
    # (f32-granule path materializes them at 4 bytes/elem).
    kernel_temp = 2 * tn * tc * (4 if itemsize < 4 else itemsize)
    vmem_limit = 2 * 2 * tile_bytes + kernel_temp + (2 << 20)
    vmem_limit = int(min(max(vmem_limit, 16 << 20), 56 << 20))  # <= v7x 64 MiB phys

    return pl.pallas_call(
        _swap_axes_kernel,
        out_shape=jax.ShapeDtypeStruct((B, C, N), x.dtype),
        grid_spec=pltpu.PrefetchScalarGridSpec(
            num_scalar_prefetch=0,
            grid=grid,
            in_specs=[pl.BlockSpec((pl.Squeezed(), tn, tc),
                                   lambda b, n, c: (b, n, c))],
            out_specs=pl.BlockSpec((pl.Squeezed(), tc, tn),
                                   lambda b, n, c: (b, c, n)),
        ),
        compiler_params=pltpu.CompilerParams(
            dimension_semantics=("parallel", "parallel", "parallel"),
            vmem_limit_bytes=vmem_limit,
        ),
        cost_estimate=pl.CostEstimate(
            flops=0,
            transcendentals=0,
            bytes_accessed=2 * B * N * C * itemsize,
        ),
    )(x)


if __name__ == "__main__":
    key = jax.random.PRNGKey(0)
    k0, k1, k2, k3, k4 = jax.random.split(key, 5)

    # 1) Small (B, N, C) point-feature layout, f32.
    B, N, C = 2, 16, 32
    x = jax.random.normal(k0, (B, N, C), dtype=jnp.float32)
    out = jax.block_until_ready(swap_axes(x))
    ref = jnp.swapaxes(x, 1, 2)
    assert out.shape == (B, C, N), out.shape
    assert out.dtype == x.dtype, out.dtype
    assert jnp.array_equal(out, ref), "f32 small-shape mismatch"

    # 2) Ragged shape handled without any wrapper pad/slice copies.
    x2 = jax.random.normal(k1, (2, 640, 200), dtype=jnp.float32)
    out2 = jax.block_until_ready(swap_axes(x2))
    assert out2.shape == (2, 200, 640), out2.shape
    assert jnp.array_equal(out2, jnp.swapaxes(x2, 1, 2)), "ragged-shape mismatch"

    # 3) B == 1 with a ragged multi-tile grid: exercises masked edge blocks on
    #    both axes and the >=2-steps-along-N split for v7x's two TensorCores.
    x3 = jax.random.normal(k2, (1, 300, 1200), dtype=jnp.float32)
    out3 = jax.block_until_ready(swap_axes(x3))
    assert out3.shape == (1, 1200, 300), out3.shape
    assert jnp.array_equal(out3, jnp.swapaxes(x3, 1, 2)), "multi-tile mismatch"

    # 4) bf16, lane-aligned tiles -> native packed XLU transpose path.
    x4 = jax.random.normal(k3, (2, 256, 128), dtype=jnp.float32).astype(jnp.bfloat16)
    out4 = jax.block_until_ready(swap_axes(x4))
    assert out4.dtype == jnp.bfloat16
    assert jnp.array_equal(out4, jnp.swapaxes(x4, 1, 2)), "bf16 aligned mismatch"

    # 5) bf16, small unaligned shape -> 32-bit-granule fallback path.
    x5 = jax.random.normal(k4, (B, N, C), dtype=jnp.float32).astype(jnp.bfloat16)
    out5 = jax.block_until_ready(swap_axes(x5))
    assert out5.dtype == jnp.bfloat16
    assert jnp.array_equal(out5, jnp.swapaxes(x5, 1, 2)), "bf16 unaligned mismatch"

    print("KERNEL_OK")
</pallas_src>

<mosaic_0001>
module attributes {stable_mosaic.version = 11 : i64} {
  func.func @_swap_axes_kernel(%arg0: i32, %arg1: i32, %arg2: i32, %arg3: memref<1x16x32xf32, #tpu.memory_space<vmem>>, %arg4: memref<1x32x16xf32, #tpu.memory_space<vmem>>) attributes {dimension_semantics = [#tpu.dimension_semantics<parallel>, #tpu.dimension_semantics<parallel>, #tpu.dimension_semantics<parallel>], iteration_bounds = array<i64: 2, 1, 1>, scalar_prefetch = 0 : i64, scratch_operands = 0 : i64, tpu.core_type = #tpu.core_type<tc>, window_params = [{transform_indices = @transform_0, window_bounds = array<i64: 1, 16, 32>}, {transform_indices = @transform_1, window_bounds = array<i64: 1, 32, 16>}]} {
    %c0 = arith.constant 0 : index
    %c0_0 = arith.constant 0 : index
    %c0_1 = arith.constant 0 : index
    %0 = vector.load %arg3[%c0, %c0_0, %c0_1] : memref<1x16x32xf32, #tpu.memory_space<vmem>>, vector<1x16x32xf32>
    %1 = vector.shape_cast %0 : vector<1x16x32xf32> to vector<16x32xf32>
    %2 = tpu.transpose %1, [1, 0] : vector<16x32xf32> -> vector<32x16xf32>
    %c0_2 = arith.constant 0 : index
    %c0_3 = arith.constant 0 : index
    %c0_4 = arith.constant 0 : index
    %3 = vector.load %arg4[%c0_2, %c0_3, %c0_4] : memref<1x32x16xf32, #tpu.memory_space<vmem>>, vector<1x32x16xf32>
    %4 = vector.shape_cast %3 : vector<1x32x16xf32> to vector<32x16xf32>
    %5 = vector.shape_cast %2 : vector<32x16xf32> to vector<1x32x16xf32>
    tpu.vector_store %arg4[%c0_2, %c0_3, %c0_4], %5 {strides = array<i32>} : memref<1x32x16xf32, #tpu.memory_space<vmem>>, vector<1x32x16xf32>,
    return
  }
  func.func @transform_0(%arg0: i32, %arg1: i32, %arg2: i32) -> (i32, i32, i32) {
    %c0_i32 = arith.constant 0 : i32
    return %arg0, %arg1, %arg2 : i32, i32, i32
  }
  func.func @transform_1(%arg0: i32, %arg1: i32, %arg2: i32) -> (i32, i32, i32) {
    %c0_i32 = arith.constant 0 : i32
    return %arg0, %arg2, %arg1 : i32, i32, i32
  }
}

</mosaic_0001>

<bundles_post_ra>
// kernel: tpu_custom_call.1
= control target key start
LH: loop header
LB: loop body
LE: loop exit
PB: predicated region body
PF: predicated region fallthrough
CT: control target
= control target key end

     0   :  { %6 = vsyncpa [#allocation3], 0  ;;  %s623_s0 = inlined_call_operand.hbm [shape: f32[2,16,32], index: 0, kind: input, shape index: {}]   ;;  %s624_s1 = inlined_call_operand.vmem [shape: f32[2,32,16], index: 1, kind: output, shape index: {}]  }
   0x1   :  { %8 = vsyncpa [#allocation3 + $0x1], 0  ;;  %s499_s6 = smov 0   ;;  %s501_s7 = smov 0  }
   0x2   :  { %s503_s8 = smov 0   ;;  %s505_s9 = smov 0  }
   0x3   :  { %s507_s10 = smov 0   ;;  %s509_s11 = smov 0  }
   0x4 LB: > { %s331_s12 = sadd.s32 4294967295, %s484_s11   ;;  %s33_s13 = sadd.s32 1, %s480_s10  ;;  %s484_s11 = sphi %s509_s11, %s14_s11   ;;  %s480_s10 = sphi %s507_s10, %s632_s10   ;;  %s476_s9 = sphi %s505_s9, %s631_s9   ;;  %s472_s8 = sphi %s503_s8, %s630_s8   ;;  %s468_s7 = sphi %s501_s7, %s629_s7   ;;  %s464_s6 = sphi %s499_s6, %s628_s6  }
   0x5   : > { %p35_p0 = scmp.ge.s32.totalorder %s33_s13, 2  ;;  %s44_s14 = sadd.s32 1, %s472_s8 }
   0x6   : > { %p51_p1 = scmp.ne.s32.totalorder %s472_s8, %s468_s7  ;;  %p52_p2 = scmp.eq.s32.totalorder %s484_s11, 0 }
   0x7   : > { %s634_s13 = smov (%p35_p0, %s33_s13), 0  ;;  %p57_p4 = scmp.ne.s32.totalorder %s468_s7, %s464_s6 }
   0x8   : > { %p535_p3 = por %p52_p2, %p51_p1  ;;  %s37_s16 = ssub.s32 %s480_s10, %s634_s13 }
   0x9   : > { %p58_p5 = scmp.eq.s32.totalorder %s331_s12, 0  ;;  %p42_p6 = scmp.eq.s32.totalorder %s37_s16, 0 }
   0xa   : > { %p352_p8 = scmp.lt.s32.totalorder %s484_s11, 2  ;;  %s111_s19 = sand.u32 1, %s472_s8  }
   0xb   : > { %p542_p7 = por %p58_p5, %p57_p4  ;;  %s344_s20 = sshll.u32 %s480_s10, 8 }
   0xc   : > { %s548_s18 = scalar_select %p42_p6, %s472_s8, %s44_s14  }
   0xd   : > { %s335_s21 = sshll.u32 %s111_s19, 4  ;;  %s555_s24 = scalar_lea.hbm %s623_s0, %s344_s20 }
   0xe   : > { %s115_s25 = scalar_lea.vmem [#allocation2], %s335_s21  ;;  %p559_p9 = pnand %p352_p8, %p535_p3 }
   0xf   : > { %s125_s26 = sshll.u32 %s115_s25, 4  ;;  %s565_s28 = scalar_lea.sflag [#allocation3], %s111_s19  ;;  %s563_s26 = int_to_ptr.vmem [resolvable:$true] %s125_s26 }
  0x10   : > { %s404_s29 = scalar_lea.hbm %s555_s24, 256  ;;  %p406_p11 = pneg %p559_p9 }
  0x11   : > { %p405_p10 = scmp.ne.s32.totalorder %s555_s24, %s404_s29  ;;  %s409_s3 = scalar_lea.hbm %s623_s0, 512 }
  0x12   : > { %p410_p0 = scmp.lt.u32.totalorder %s555_s24, %s623_s0  ;;  %p411_p1 = scmp.lt.u32.totalorder %s409_s3, %s404_s29 }
  0x13   : > { %p407_p12 = pnand %p406_p11, %p405_p10  ;;  %p413_p3 = scmp.lt.u32.totalorder %s404_s29, %s555_s24 }
  0x14   : > { %p412_p2 = por %p411_p1, %p410_p0 }
  0x15   : > { %p408_p13 = pneg %p407_p12 }
  0x16   : > { %p414_p4 = por %p413_p3, %p412_p2 }
  0x18   : > { %p415_p5 = pnand %p414_p4, %p408_p13 }
  0x1a   : > { %418 = shalt.err (!%p415_p5)
}
  0x1b   : > { %s419_s6 = scalar_lea.vmem %s563_s26, 256  ;;  %s486_s12 = smov [#allocation2]  }
  0x1c   : > { %p420_p6 = scmp.ne.s32.totalorder %s563_s26, %s419_s6  ;;  %s424_s14 = sshll.u32 %s486_s12, 4  ;;  %s425_s14 = int_to_ptr.vmem [resolvable:$false] %s424_s14 }
  0x1d   : > { %s426_s15 = scalar_lea.vmem %s425_s14, 512  ;;  %p427_p12 = scmp.lt.s32.totalorder %s563_s26, %s425_s14 }
  0x1e   : > { %p422_p8 = pnand %p420_p6, %p406_p11  ;;  %p428_p0 = scmp.lt.s32.totalorder %s426_s15, %s419_s6 }
  0x20   : > { %p423_p10 = pneg %p422_p8  ;;  %p429_p1 = por %p428_p0, %p427_p12 }
  0x22   : > { %p430_p2 = pnand %p429_p1, %p423_p10 }
  0x24   : > { %433 = shalt.err (!%p430_p2)
}
  0x25   : > { %s487_s16 = smov 128   ;;  %s488_s19 = smov 8  }
  0x26   : > { %351 = dma.hbm_to_vmem [thread:$0]  (!%p559_p9), %s555_s24, 256, %s563_s26, %s565_s28, %s487_s16, %s487_s16, %s488_s19  }
  0x27   : > { %p338_p11 = scmp.ge.s32.totalorder %s484_s11, 1  ;;  %p133_p13 = scmp.lt.s32.totalorder %s484_s11, 3 }
  0x29   : > { %p134_p3 = pnand %p338_p11, %p133_p13 }
  0x2a   : > { %s139_s20 = sand.u32 (!%p134_p3), 1, %s468_s7  }
  0x2b   : > { %137 = sbr.rel (%p134_p3) target bundleno = 194 (0xc2), region = 24  ;;  %s339_s21 = sshll.u32 (!%p134_p3), %s139_s20, 4 }
  0x2c   : > { %s140_s22 = scalar_lea.sflag (!%p134_p3), [#allocation3], %s139_s20  ;;  %s143_s23 = scalar_lea.vmem (!%p134_p3), [#allocation2], %s339_s21 }
  0x32   : > { %459 = dma.done.wait (%p542_p7), %s140_s22, 256  }
  0x33   : > { %461 = vsyncadd (%p542_p7), %s140_s22, 4294967040  ;;  %v183_v0 = vld [vmem:[%s143_s23] sm:$0xff]  ;;  %v184_v1 = vld [vmem:[%s143_s23 + $0x8] sm:$0xff]  ;;  %p171_p9 = scmp.lt.s32.totalorder %s476_s9, 1  ;;  %vm217_vm0 = vcmask 130048  }
  0x34   : > { %185 = vxpose.xlu0.b32.start [1/2] (short) (narrow) %v183_v0, 32 }
  0x35   : > { %s636_s9 = smov (!%p171_p9, %s476_s9), 1 }
  0x36   : > { %s345_s24 = sshll.u32 %s636_s9, 5 }
  0x37   : > { %s181_s27 = scalar_lea.vmem %s624_s1, %s345_s24 }
  0x38   : > { %186 = vxpose.xlu0.b32.end [2/2] (short) (narrow) %v184_v1, 32 }
  0xb4   : > { %v201_v2 = vpop.trf.xlu0 }
  0xb5   : > { %218 = vst.msk [vmem:[%s181_s27] sm:$0xff] %vm217_vm0, %v201_v2 }
  0xb8   : > { %v202_v3 = vpop.trf.xlu0 }
  0xb9   : > { %219 = vst.msk [vmem:[%s181_s27 + $0x8] sm:$0xff] %vm217_vm0, %v202_v3 }
  0xbc   : > { %v203_v4 = vpop.trf.xlu0 }
  0xbd   : > { %220 = vst.msk [vmem:[%s181_s27 + $0x10] sm:$0xff] %vm217_vm0, %v203_v4 }
  0xc0   : > { %v204_v5 = vpop.trf.xlu0 }
  0xc1   : > { %221 = vst.msk [vmem:[%s181_s27 + $0x18] sm:$0xff] %vm217_vm0, %v204_v5 }
  0xc2 PF: > { %s14_s11 = sadd.s32 1, %s484_s11   ;;  %s628_s6 = smov %s468_s7 }
  0xc3   : > { %p11_p7 = scmp.ge.s32.totalorder %s14_s11, 4   ;;  %s629_s7 = smov %s472_s8 }
  0xc4   : > { %s630_s8 = smov %s548_s18  ;;  %s631_s9 = smov %s480_s10 }
  0xc5   : > { %s632_s10 = smov %s634_s13  ;;  %13 = sbr.rel (!%p11_p7) target bundleno = 4 (0x4), region = 64 }
  0xcc   :  { %258 = vsyncpa [#allocation3], 1 }
  0xcd   :  { %260 = vsyncpa [#allocation3 + $0x1], 1 }

</bundles_post_ra>
